<compile_context>
chip_gen: v6e
topology: v6e:2x2x1
jax: 0.10.0
libtpu: 0.0.40
codegen_flags: <defaults>
</compile_context>

<pallas_src>
from functools import partial

import jax
import jax.numpy as jnp
from jax.experimental import pallas as pl
from jax.experimental.pallas import tpu as pltpu


# --------------------------------------------------------------------------- #
# Kernel 1: QKV projection  x @ W_qkv                                          #
# --------------------------------------------------------------------------- #
def qkv_proj_kernel(x_ref, w_ref, o_ref):
    # x_ref: (1, tn, C); w_ref: (C, tco); o_ref: (1, tn, tco)
    o_ref[0] = jnp.dot(x_ref[0], w_ref[...],
                       preferred_element_type=jnp.float32).astype(o_ref.dtype)


# --------------------------------------------------------------------------- #
# Kernel 2: fused per-head-group attention + output projection                 #
# --------------------------------------------------------------------------- #
def attn_proj_kernel(q_ref, k_ref, v_ref, wp_ref, bp_ref, out_ref, *rest,
                     scale, head_dim, heads_per_block, num_groups, seq_len,
                     emit_attn, emit_qkv, exact_softmax):
    # q/k/v_ref: (1, Np, Hb*Dh)   wp_ref: (C, C) resident   bp_ref: (1, C)
    # out_ref: (1, Np, C)
    # optional: attn_ref (1, Hb, Np, Np), qkv_ref (3, 1, Hb, Np, Dh)
    # scratch:  acc_ref (Np, C) f32, accumulates the projection over groups.
    rest = list(rest)
    acc_ref = rest.pop()                              # scratch is always last
    attn_ref = rest.pop(0) if emit_attn else None
    qkv_ref = rest.pop(0) if emit_qkv else None

    g = pl.program_id(1)
    group_width = heads_per_block * head_dim

    qb = q_ref[0]                                     # (Np, Hb*Dh)
    kb = k_ref[0]
    vb = v_ref[0]
    padded_n = qb.shape[0]

    needs_mask = padded_n != seq_len                  # static python bool
    if needs_mask:
        key_valid = (jax.lax.broadcasted_iota(jnp.int32, (padded_n, padded_n), 1)
                     < seq_len)

    ctx_parts = []
    for i in range(heads_per_block):                  # static unroll over heads
        sl = slice(i * head_dim, (i + 1) * head_dim)
        q_h = qb[:, sl]
        k_h = kb[:, sl]
        v_h = vb[:, sl]

        if emit_qkv:
            # Module's qkv layout (3, B, H, N, Dh) straight from VMEM tiles.
            qkv_ref[0, 0, i] = q_h.astype(qkv_ref.dtype)
            qkv_ref[1, 0, i] = k_h.astype(qkv_ref.dtype)
            qkv_ref[2, 0, i] = v_h.astype(qkv_ref.dtype)

        # Fold scale into q (N*Dh mults instead of N*N); contract Dh of both
        # operands on the MXU (no explicit k.T).
        s = jax.lax.dot_general(q_h * scale, k_h, (((1,), (1,)), ((), ())),
                                preferred_element_type=jnp.float32)   # (Np, Np)
        if needs_mask:
            s = jnp.where(key_valid, s, -1e30)
        s = s - jnp.max(s, axis=-1, keepdims=True)
        e = jnp.exp(s)
        denom = jnp.sum(e, axis=-1, keepdims=True)
        if exact_softmax:
            p = e / denom
        else:
            p = e * pl.reciprocal(denom, approx=True)   # EUP slot, ~free

        if emit_attn:
            attn_ref[0, i] = p.astype(attn_ref.dtype)

        ctx_parts.append(jnp.dot(p.astype(v_h.dtype), v_h,
                                 preferred_element_type=jnp.float32))  # (Np, Dh)

    ctx = (ctx_parts[0] if heads_per_block == 1
           else jnp.concatenate(ctx_parts, axis=-1))    # (Np, Hb*Dh) f32

    @pl.when(g == 0)
    def _init():
        acc_ref[...] = jnp.zeros_like(acc_ref)

    # W_proj stays resident; slice this group's (Hb*Dh, C) slab in-kernel so it
    # is only DMA'd from HBM once (not once per batch element).
    if num_groups == 1:
        wp_slab = wp_ref[...]
    else:
        row0 = pl.multiple_of(g * group_width, group_width)
        wp_slab = wp_ref[pl.ds(row0, group_width), :]

    acc_ref[...] += jnp.dot(ctx.astype(wp_slab.dtype), wp_slab,
                            preferred_element_type=jnp.float32)

    @pl.when(g == num_groups - 1)
    def _finalize():
        out_ref[0] = (acc_ref[...]
                      + bp_ref[...].astype(jnp.float32)).astype(out_ref.dtype)


# --------------------------------------------------------------------------- #
# Wrapper                                                                      #
# --------------------------------------------------------------------------- #
def _pick_heads_per_block(num_heads, head_dim):
    # Prefer a 256-lane head group (fills the v6e/v7x MXU), else 128 lanes.
    for lanes in (256, 128):
        if lanes % head_dim == 0:
            hb = lanes // head_dim
            if num_heads % hb == 0:
                return hb
    if head_dim % 128 == 0:
        return 1
    raise ValueError(
        f"Unsupported head_dim={head_dim} / num_heads={num_heads}: need "
        "head_dim to divide 128/256 (with num_heads divisible by the group "
        "size) or head_dim to be a multiple of 128.")


def _pick_out_tile(total, candidates=(1536, 1152, 768, 512, 384, 256, 128)):
    for c in candidates:
        if total % c == 0:
            return c
    return total


def attention_forward(x, w_qkv, w_proj, b_proj, *, num_heads, qk_scale=None,
                      return_attn=True, return_qkv=True, side_dtype=None,
                      exact_softmax=True, seq_align=8):
    B, N, C = x.shape
    H = num_heads
    assert C % H == 0, "dim must be divisible by num_heads"
    Dh = C // H
    Hb = _pick_heads_per_block(H, Dh)      # heads packed per grid step
    G = H // Hb                            # head groups (reduction axis)
    Wh = Hb * Dh                           # channel width per group (128/256)
    scale = float(qk_scale) if qk_scale is not None else Dh ** (-0.5)
    side_dtype = x.dtype if side_dtype is None else side_dtype

    # Pad the sequence so block sublane dims stay aligned; padded key columns
    # are masked inside the kernel.  Use seq_align=128 for production ViT N
    # (197 -> 256) so the NxN attn blocks are lane-dense (unmasked vst).
    Np = ((N + seq_align - 1) // seq_align) * seq_align
    x_p = x if Np == N else jnp.pad(x, ((0, 0), (0, Np - N), (0, 0)))

    # ---- 1) QKV projection (qkv_bias=False) ------------------------------- #
    tn = min(Np, 256)                      # 256-row tiles match v6e/v7x MXU
    tco = _pick_out_tile(3 * C)            # tile 3C: W_qkv never fully resident
    n_co = pl.cdiv(3 * C, tco)
    qkv_flat = pl.pallas_call(
        qkv_proj_kernel,
        out_shape=jax.ShapeDtypeStruct((B, Np, 3 * C), x.dtype),
        # co outermost: each W_qkv column tile streams from HBM exactly once.
        grid=(n_co, B, pl.cdiv(Np, tn)),
        in_specs=[
            pl.BlockSpec((1, tn, C), lambda co, b, n: (b, n, 0)),
            pl.BlockSpec((C, tco), lambda co, b, n: (0, co)),
        ],
        out_specs=pl.BlockSpec((1, tn, tco), lambda co, b, n: (b, n, co)),
        compiler_params=pltpu.CompilerParams(
            dimension_semantics=("parallel", "parallel", "parallel")),
    )(x_p, w_qkv)

    # ---- 2) fused attention + output projection --------------------------- #
    # In qkv_flat, Q group g lives at channels [g*Wh, (g+1)*Wh), K group g at
    # [C + g*Wh, ...), V group g at [2C + g*Wh, ...)  ->  block indices along
    # the channel axis are g, G + g, 2G + g (block size Wh).
    q_spec = pl.BlockSpec((1, Np, Wh), lambda b, g: (b, 0, g))
    k_spec = pl.BlockSpec((1, Np, Wh), lambda b, g: (b, 0, G + g))
    v_spec = pl.BlockSpec((1, Np, Wh), lambda b, g: (b, 0, 2 * G + g))

    out_shapes = [jax.ShapeDtypeStruct((B, Np, C), x.dtype)]
    out_specs = [pl.BlockSpec((1, Np, C), lambda b, g: (b, 0, 0))]      # acc
    if return_attn:
        out_shapes.append(jax.ShapeDtypeStruct((B, H, Np, Np), side_dtype))
        out_specs.append(pl.BlockSpec((1, Hb, Np, Np), lambda b, g: (b, g, 0, 0)))
    if return_qkv:
        out_shapes.append(jax.ShapeDtypeStruct((3, B, H, Np, Dh), side_dtype))
        out_specs.append(
            pl.BlockSpec((3, 1, Hb, Np, Dh), lambda b, g: (0, b, g, 0, 0)))

    results = pl.pallas_call(
        partial(attn_proj_kernel, scale=scale, head_dim=Dh, heads_per_block=Hb,
                num_groups=G, seq_len=N, emit_attn=return_attn,
                emit_qkv=return_qkv, exact_softmax=exact_softmax),
        out_shape=tuple(out_shapes),
        grid=(B, G),
        in_specs=[
            q_spec, k_spec, v_spec,
            pl.BlockSpec((C, C), lambda b, g: (0, 0)),    # W_proj resident
            pl.BlockSpec((1, C), lambda b, g: (0, 0)),    # bias resident
        ],
        out_specs=tuple(out_specs),
        scratch_shapes=[pltpu.VMEM((Np, C), jnp.float32)],
        compiler_params=pltpu.CompilerParams(
            dimension_semantics=("parallel", "arbitrary")),
    )(qkv_flat, qkv_flat, qkv_flat, w_proj, b_proj.reshape(1, C))

    results = list(results)
    out = results.pop(0)
    attn = results.pop(0) if return_attn else None
    qkv = results.pop(0) if return_qkv else None

    if Np != N:
        out = out[:, :N]
        if attn is not None:
            attn = attn[:, :, :N, :N]
        if qkv is not None:
            qkv = qkv[:, :, :, :N, :]
    return out, attn, qkv


# --------------------------------------------------------------------------- #
# Pure-JAX reference                                                           #
# --------------------------------------------------------------------------- #
def reference_forward(x, w_qkv, w_proj, b_proj, *, num_heads):
    B, N, C = x.shape
    Dh = C // num_heads
    scale = Dh ** (-0.5)
    hp = jax.lax.Precision.HIGHEST
    qkv = jnp.dot(x, w_qkv, precision=hp).reshape(B, N, 3, num_heads, Dh)
    qkv = qkv.transpose(2, 0, 3, 1, 4)
    q, k, v = qkv[0], qkv[1], qkv[2]
    attn = jax.nn.softmax(
        jnp.einsum('bhnd,bhmd->bhnm', q, k, precision=hp) * scale, axis=-1)
    ctx = jnp.einsum('bhnm,bhmd->bhnd', attn, v, precision=hp)
    out = jnp.dot(ctx.transpose(0, 2, 1, 3).reshape(B, N, C),
                  w_proj, precision=hp) + b_proj
    return out, attn, qkv


# --------------------------------------------------------------------------- #
# Main                                                                         #
# --------------------------------------------------------------------------- #
if __name__ == "__main__":
    def make_inputs(B, N, C):
        key = jax.random.PRNGKey(0)
        kx, kq, kp, kb = jax.random.split(key, 4)
        x = jax.random.normal(kx, (B, N, C), dtype=jnp.float32)
        w_qkv = jax.random.normal(kq, (C, 3 * C), dtype=jnp.float32) * 0.02
        w_proj = jax.random.normal(kp, (C, C), dtype=jnp.float32) * 0.02
        b_proj = jax.random.normal(kb, (C,), dtype=jnp.float32) * 0.02
        return x, w_qkv, w_proj, b_proj

    def check_f32(B, N, C, H):
        x, w_qkv, w_proj, b_proj = make_inputs(B, N, C)
        out, attn, qkv = jax.block_until_ready(
            attention_forward(x, w_qkv, w_proj, b_proj, num_heads=H))
        out_r, attn_r, qkv_r = reference_forward(
            x, w_qkv, w_proj, b_proj, num_heads=H)
        assert out.shape == (B, N, C)
        assert attn.shape == (B, H, N, N)
        assert qkv.shape == (3, B, H, N, C // H)
        assert jnp.allclose(qkv, qkv_r, atol=1e-4, rtol=1e-4)
        assert jnp.allclose(attn, attn_r, atol=5e-3, rtol=5e-3)
        assert jnp.allclose(out, out_r, atol=5e-3, rtol=5e-3)

    # 1) Dh=128: two heads packed into one 256-lane group (v6e/v7x MXU width).
    check_f32(B=2, N=8, C=256, H=2)
    # 2) Standard ViT head_dim=64: four heads packed per group (Dh<128 path).
    check_f32(B=2, N=8, C=256, H=4)
    # 3) Ragged sequence: N=12 padded to 16 with in-kernel key masking.
    check_f32(B=1, N=12, C=256, H=2)
    # 4) Two head groups: exercises accumulation over the 'arbitrary' axis and
    #    the dynamic W_proj slab slice out of the resident (C, C) block.
    check_f32(B=1, N=8, C=512, H=4)

    # 5) bf16 fast path with the HBM-heavy side outputs disabled
    #    (the single biggest wall-clock lever per the perf review).
    x, w_qkv, w_proj, b_proj = make_inputs(2, 8, 256)
    out_bf16, attn_none, qkv_none = jax.block_until_ready(
        attention_forward(x.astype(jnp.bfloat16), w_qkv.astype(jnp.bfloat16),
                          w_proj.astype(jnp.bfloat16),
                          b_proj.astype(jnp.bfloat16),
                          num_heads=2, return_attn=False, return_qkv=False))
    out_r, _, _ = reference_forward(x, w_qkv, w_proj, b_proj, num_heads=2)
    assert attn_none is None and qkv_none is None
    assert out_bf16.shape == (2, 8, 256)
    assert bool(jnp.all(jnp.isfinite(out_bf16.astype(jnp.float32))))
    assert jnp.allclose(out_bf16.astype(jnp.float32), out_r, atol=1e-1, rtol=1e-1)

    print("KERNEL_OK")
</pallas_src>

<mosaic_0001>
module attributes {stable_mosaic.version = 11 : i64} {
  func.func @qkv_proj_kernel(%arg0: i32, %arg1: i32, %arg2: i32, %arg3: memref<1x8x256xf32, #tpu.memory_space<vmem>>, %arg4: memref<256x768xf32, #tpu.memory_space<vmem>>, %arg5: memref<1x8x768xf32, #tpu.memory_space<vmem>>) attributes {dimension_semantics = [#tpu.dimension_semantics<parallel>, #tpu.dimension_semantics<parallel>, #tpu.dimension_semantics<parallel>], iteration_bounds = array<i64: 1, 2, 1>, scalar_prefetch = 0 : i64, scratch_operands = 0 : i64, tpu.core_type = #tpu.core_type<tc>, window_params = [{transform_indices = @transform_0, window_bounds = array<i64: 1, 8, 256>}, {transform_indices = @transform_1, window_bounds = array<i64: 256, 768>}, {transform_indices = @transform_2, window_bounds = array<i64: 1, 8, 768>}]} {
    %c0 = arith.constant 0 : index
    %c0_0 = arith.constant 0 : index
    %c0_1 = arith.constant 0 : index
    %0 = vector.load %arg3[%c0, %c0_0, %c0_1] : memref<1x8x256xf32, #tpu.memory_space<vmem>>, vector<1x8x256xf32>
    %1 = vector.shape_cast %0 : vector<1x8x256xf32> to vector<8x256xf32>
    %c0_2 = arith.constant 0 : index
    %c0_3 = arith.constant 0 : index
    %2 = vector.load %arg4[%c0_2, %c0_3] : memref<256x768xf32, #tpu.memory_space<vmem>>, vector<256x768xf32>
    %cst = arith.constant dense<0.000000e+00> : vector<8x768xf32>
    %3 = tpu.matmul %1, %2, %cst {dimension_numbers = #tpu.dot_dimension_numbers<[1], [0], [0], [1], [0, 0, 1, 1], [], []>} : vector<8x256xf32>, vector<256x768xf32>, vector<8x768xf32> -> vector<8x768xf32>
    %c0_4 = arith.constant 0 : index
    %c0_5 = arith.constant 0 : index
    %c0_6 = arith.constant 0 : index
    %4 = vector.load %arg5[%c0_4, %c0_5, %c0_6] : memref<1x8x768xf32, #tpu.memory_space<vmem>>, vector<1x8x768xf32>
    %5 = vector.shape_cast %4 : vector<1x8x768xf32> to vector<8x768xf32>
    %6 = vector.shape_cast %3 : vector<8x768xf32> to vector<1x8x768xf32>
    tpu.vector_store %arg5[%c0_4, %c0_5, %c0_6], %6 {strides = array<i32>} : memref<1x8x768xf32, #tpu.memory_space<vmem>>, vector<1x8x768xf32>,
    return
  }
  func.func @transform_0(%arg0: i32, %arg1: i32, %arg2: i32) -> (i32, i32, i32) {
    %c0_i32 = arith.constant 0 : i32
    %c0_i32_0 = arith.constant 0 : i32
    return %arg1, %arg2, %c0_i32 : i32, i32, i32
  }
  func.func @transform_1(%arg0: i32, %arg1: i32, %arg2: i32) -> (i32, i32) {
    %c0_i32 = arith.constant 0 : i32
    %c0_i32_0 = arith.constant 0 : i32
    return %c0_i32, %arg0 : i32, i32
  }
  func.func @transform_2(%arg0: i32, %arg1: i32, %arg2: i32) -> (i32, i32, i32) {
    %c0_i32 = arith.constant 0 : i32
    return %arg1, %arg2, %arg0 : i32, i32, i32
  }
}

</mosaic_0001>

<bundles_post_ra>
// kernel: tpu_custom_call.1
= control target key start
LH: loop header
LB: loop body
LE: loop exit
PB: predicated region body
PF: predicated region fallthrough
CT: control target
= control target key end

     0   :  { %7 = vsyncpa [#allocation3], 0  ;;  %s1185_s0 = inlined_call_operand.hbm [shape: f32[2,8,256], index: 0, kind: input, shape index: {}]   ;;  %s1186_s1 = inlined_call_operand.hbm [shape: f32[256,768], index: 1, kind: input, shape index: {}]   ;;  %s1187_s2 = inlined_call_operand.hbm [shape: f32[2,8,768], index: 2, kind: output, shape index: {}]  }
   0x1   :  { %9 = vsyncpa [#allocation3 + $0x1], 0 }
   0x2   :  { %10 = vsyncpa [#allocation6], 0 }
   0x3   :  { %11 = vsyncpa [#allocation4], 0 }
   0x4   :  { %13 = vsyncpa [#allocation4 + $0x1], 0  ;;  %s997_s9 = smov 0   ;;  %s999_s10 = smov 0  }
   0x5   :  { %s1001_s11 = smov 0   ;;  %s1003_s12 = smov 0  }
   0x6   :  { %s1005_s13 = smov 0   ;;  %s1007_s14 = smov 0  }
   0x7 LB: > { %s745_s15 = sadd.s32 4294967295, %s975_s14   ;;  %s746_s16 = sadd.s32 4294967294, %s975_s14   ;;  %s975_s14 = sphi %s1007_s14, %s19_s14   ;;  %s971_s13 = sphi %s1005_s13, %s1205_s13   ;;  %s967_s12 = sphi %s1003_s12, %s1204_s12   ;;  %s963_s11 = sphi %s1001_s11, %s1203_s11   ;;  %s959_s10 = sphi %s999_s10, %s1202_s10   ;;  %s955_s9 = sphi %s997_s9, %s1201_s9  }
   0x8   : > { %p60_p0 = scmp.ne.s32.totalorder %s959_s10, %s955_s9  ;;  %p1031_p1 = scmp.eq.s32.totalorder %s745_s15, 0 }
   0x9   : > { %p1035_p2 = scmp.eq.s32.totalorder %s745_s15, 1  ;;  %p120_p3 = scmp.eq.s32.totalorder %s746_s16, 1 }
   0xa   : > { %p1041_p4 = por %p1031_p1, %p60_p0  ;;  %p747_p5 = scmp.ge.s32.totalorder %s975_s14, 1 }
   0xb   : > { %p1046_p6 = por %p120_p3, %p60_p0  ;;  %p127_p7 = scmp.lt.s32.totalorder %s975_s14, 3 }
   0xc   : > { %s1191_s19 = scalar_select %p1041_p4, 1, 0 }
   0xd   : > { %s1192_s20 = scalar_select %p1046_p6, 1, 0 }
   0xe   : > { %p1051_p8 = pnand %p747_p5, %p127_p7  ;;  %s977_s22 = smov [#allocation5]  }
   0xf   : > { %s142_s23 = sshll.u32 %s977_s22, 4  ;;  %s34_s25 = sadd.s32 1, %s971_s13  ;;  %s143_s23 = int_to_ptr.vmem [resolvable:$true] %s142_s23 }
  0x10   : > { %p770_p9 = pneg %p1051_p8  ;;  %s848_s26 = scalar_lea.vmem %s143_s23, 24576 }
  0x11   : > { %p849_p13 = scmp.ne.s32.totalorder %s143_s23, %s848_s26  ;;  %p856_p5 = scmp.lt.s32.totalorder %s143_s23, %s143_s23 }
  0x12   : > { %p1060_p11 = pnand %p770_p9, %p1031_p1  ;;  %p857_p7 = scmp.lt.s32.totalorder %s848_s26, %s848_s26 }
  0x14   : > { %p839_p12 = pneg %p1060_p11  ;;  %p858_p6 = por %p857_p7, %p856_p5 }
  0x16   : > { %p851_p0 = pnand %p849_p13, %p839_p12 }
  0x18   : > { %p852_p3 = pneg %p851_p0 }
  0x1a   : > { %p859_p4 = pnand %p858_p6, %p852_p3 }
  0x1c   : > { %862 = shalt.err (!%p859_p4)
}
  0x1d   : > { %s978_s27 = smov 768   ;;  %s979_s28 = smov 48  }
  0x1e   : > { %773 = dma.hbm_to_vmem [thread:$0]  (!%p1060_p11), %s1186_s1, 24576, %s143_s23, [#allocation6], %s978_s27, %s978_s27, %s979_s28  }
  0x1f   : > { %p36_p6 = scmp.ge.s32.totalorder %s34_s25, 2  ;;  %s47_s3 = sadd.s32 1, %s963_s11 }
  0x20   : > { %p54_p4 = scmp.ne.s32.totalorder %s963_s11, %s959_s10  ;;  %p55_p9 = scmp.eq.s32.totalorder %s975_s14, 0 }
  0x21   : > { %s1207_s25 = smov (%p36_p6, %s34_s25), 0  ;;  %p783_p0 = scmp.lt.s32.totalorder %s975_s14, 2 }
  0x22   : > { %p1078_p12 = por %p55_p9, %p54_p4  ;;  %p1084_p13 = por %p1035_p2, %p54_p4 }
  0x23   : > { %s42_s6 = ssub.s32 %s971_s13, %s1207_s25  ;;  %s156_s7 = sand.u32 1, %s963_s11  }
  0x24   : > { %p45_p11 = scmp.eq.s32.totalorder %s42_s6, 0  ;;  %s750_s8 = sshll.u32 %s156_s7, 4 }
  0x25   : > { %s759_s16 = sshll.u32 %s971_s13, 8  ;;  %s160_s26 = scalar_lea.vmem [#allocation2], %s750_s8 }
  0x26   : > { %s1093_s15 = scalar_select %p45_p11, %s963_s11, %s47_s3  }
  0x27   : > { %s168_s24 = scalar_lea.hbm %s1185_s0, %s759_s16  ;;  %s170_s27 = sshll.u32 %s160_s26, 4  ;;  %s171_s27 = int_to_ptr.vmem [resolvable:$true] %s170_s27 }
  0x28   : > { %p1101_p2 = pnand %p783_p0, %p1078_p12  ;;  %s157_s28 = scalar_lea.sflag [#allocation3], %s156_s7 }
  0x29   : > { %s876_s29 = scalar_lea.vmem %s171_s27, 256  ;;  %s980_s30 = smov [#allocation2]  }
  0x2a   : > { %p865_p3 = pneg %p1101_p2  ;;  %p877_p5 = scmp.ne.s32.totalorder %s171_s27, %s876_s29 }
  0x2b   : > { %s881_s3 = sshll.u32 %s980_s30, 4  ;;  %s882_s3 = int_to_ptr.vmem [resolvable:$false] %s881_s3 }
  0x2c   : > { %p879_p7 = pnand %p877_p5, %p865_p3  ;;  %s883_s6 = scalar_lea.vmem %s882_s3, 512 }
  0x2d   : > { %p884_p4 = scmp.lt.s32.totalorder %s171_s27, %s882_s3  ;;  %p885_p9 = scmp.lt.s32.totalorder %s883_s6, %s876_s29 }
  0x2e   : > { %p880_p6 = pneg %p879_p7 }
  0x2f   : > { %p886_p11 = por %p885_p9, %p884_p4 }
  0x31   : > { %p887_p10 = pnand %p886_p11, %p880_p6 }
  0x33   : > { %890 = shalt.err (!%p887_p10)
}
  0x34   : > { %777 = dma.hbm_to_vmem [thread:$0]  (!%p1101_p2), %s168_s24, 256, %s171_s27, %s157_s28  }
  0x35   : > { %179 = sbr.rel (%p1051_p8) target bundleno = 398 (0x18e), region = 28  ;;  %s1112_s4 = sand.u32 (!%p1051_p8), 1, %s959_s10  }
  0x36   : > { %s754_s7 = sshll.u32 (!%p1051_p8), %s1112_s4, 4  ;;  %s182_s8 = scalar_lea.sflag (!%p1051_p8), [#allocation3], %s1112_s4 }
  0x37   : > { %s1116_s16 = scalar_lea.vmem (!%p1051_p8), [#allocation2], %s754_s7  ;;  %p1198_p12 = scmp.ne.s32.totalorder (!%p1051_p8), %s1191_s19, 0 }
  0x3a   : > { %942 = dma.done.wait (%p1198_p12), %s182_s8, 256  }
  0x3b   : > { %944 = vsyncadd (%p1198_p12), %s182_s8, 4294967040 }
  0x3c   : > { %946 = dma.done.wait (%p1031_p1), [#allocation6], 24576  }
  0x3d   : > { %948 = vsyncadd (%p1031_p1), [#allocation6], 4294942720  ;;  %v305_v0 = vld [vmem:[#allocation5 + $0x2d8] sm:$0xff]  ;;  %v304_v1 = vld [vmem:[#allocation5 + $0x2d0] sm:$0xff]  ;;  %s760_s17 = smul.u32 48, %s1112_s4  ;;  %s626_s27 = scalar_lea.sflag [#allocation4], %s1112_s4 }
  0x3e   : > { %v299_v2 = vld [vmem:[#allocation5 + $0x2a8] sm:$0xff]  ;;  %406 = vmatprep.subr.mxu0 %v305_v0  ;;  %v298_v3 = vld [vmem:[#allocation5 + $0x2a0] sm:$0xff]  ;;  %v293_v4 = vld [vmem:[#allocation5 + $0x278] sm:$0xff]  ;;  %s761_s21 = smul.u32 768, %s967_s12  ;;  %s981_s28 = smov [#allocation7]  }
  0x3f   : > { %407 = vmatpush1.msra.mxu0 %v304_v1  ;;  %v292_v5 = vld [vmem:[#allocation5 + $0x270] sm:$0xff]  ;;  %v287_v6 = vld [vmem:[#allocation5 + $0x248] sm:$0xff]  ;;  %v286_v7 = vld [vmem:[#allocation5 + $0x240] sm:$0xff]  ;;  %s209_s19 = scalar_lea.vmem [#allocation7], %s760_s17  ;;  %s895_s29 = sshll.u32 %s981_s28, 4  ;;  %s896_s29 = int_to_ptr.vmem [resolvable:$false] %s895_s29 }
  0x40   : > { %408 = vmatprep.subr.mxu0 %v299_v2  ;;  %v281_v8 = vld [vmem:[#allocation5 + $0x218] sm:$0xff]  ;;  %v280_v9 = vld [vmem:[#allocation5 + $0x210] sm:$0xff]  ;;  %v275_v10 = vld [vmem:[#allocation5 + $0x1e8] sm:$0xff]  ;;  %s644_s22 = sshll.u32 %s209_s19, 4  ;;  %s1143_s26 = scalar_lea.hbm %s1187_s2, %s761_s21  ;;  %s645_s22 = int_to_ptr.vmem [resolvable:$true] %s644_s22 }
  0x41   : > { %409 = vmatpush1.msra.mxu0 %v298_v3  ;;  %v274_v11 = vld [vmem:[#allocation5 + $0x1e0] sm:$0xff]  ;;  %v269_v12 = vld [vmem:[#allocation5 + $0x1b8] sm:$0xff]  ;;  %v268_v13 = vld [vmem:[#allocation5 + $0x1b0] sm:$0xff]  ;;  %s891_s18 = scalar_lea.vmem %s645_s22, 768  ;;  %s897_s12 = scalar_lea.vmem %s896_s29, 1536 }
  0x42   : > { %410 = vmatprep.subr.mxu0 %v293_v4  ;;  %v263_v14 = vld [vmem:[#allocation5 + $0x188] sm:$0xff]  ;;  %v262_v15 = vld [vmem:[#allocation5 + $0x180] sm:$0xff]  ;;  %v257_v16 = vld [vmem:[#allocation5 + $0x158] sm:$0xff]  ;;  %p892_p1 = scmp.ne.s32.totalorder %s645_s22, %s891_s18  ;;  %p898_p0 = scmp.lt.s32.totalorder %s645_s22, %s896_s29 }
  0x43   : > { %411 = vmatpush1.msra.mxu0 %v292_v5  ;;  %v256_v17 = vld [vmem:[#allocation5 + $0x150] sm:$0xff]  ;;  %v251_v18 = vld [vmem:[#allocation5 + $0x128] sm:$0xff]  ;;  %v250_v19 = vld [vmem:[#allocation5 + $0x120] sm:$0xff]  ;;  %p899_p2 = scmp.lt.s32.totalorder %s897_s12, %s891_s18 }
  0x44   : > { %412 = vmatprep.subr.mxu0 %v287_v6  ;;  %v245_v20 = vld [vmem:[#allocation5 + $0xf8] sm:$0xff]  ;;  %v244_v21 = vld [vmem:[#allocation5 + $0xf0] sm:$0xff]  ;;  %v239_v22 = vld [vmem:[#allocation5 + $0xc8] sm:$0xff]  ;;  %p893_p8 = pnand %p892_p1, %p1084_p13 }
  0x45   : > { %413 = vmatpush1.msra.mxu0 %v286_v7  ;;  %v238_v23 = vld [vmem:[#allocation5 + $0xc0] sm:$0xff]  ;;  %v307_v24 = vld [vmem:[#allocation5 + $0x2e8] sm:$0xff]  ;;  %v233_v26 = vld [vmem:[#allocation5 + $0x98] sm:$0xff]  ;;  %p900_p3 = por %p899_p2, %p898_p0 }
  0x46   : > { %414 = vmatprep.subr.mxu0 %v281_v8  ;;  %v1127_v25 = vld [vmem:[%s1116_s16 + $0x8] sm:$0xff]  ;;  %477 = vmatprep.subr.mxu1 %v307_v24  ;;  %v306_v27 = vld [vmem:[#allocation5 + $0x2e0] sm:$0xff]  ;;  %v232_v29 = vld [vmem:[#allocation5 + $0x90] sm:$0xff]  ;;  %p894_p10 = pneg %p893_p8 }
  0x47   : > { %415 = vmatpush1.msra.mxu0 %v280_v9  ;;  %v301_v28 = vld [vmem:[#allocation5 + $0x2b8] sm:$0xff]  ;;  %470 = vmatprep.mubr.f32.mxu0 %v1127_v25  ;;  %v300_v30 = vld [vmem:[#allocation5 + $0x2b0] sm:$0xff]  ;;  %v227_v31 = vld [vmem:[#allocation5 + $0x68] sm:$0xff] }
  0x48   : > { %416 = vmatprep.subr.mxu0 %v275_v10  ;;  %478 = vmatpush1.msra.mxu1 %v306_v27  ;;  %v295_v32 = vld [vmem:[#allocation5 + $0x288] sm:$0xff]  ;;  %v226_v33 = vld [vmem:[#allocation5 + $0x60] sm:$0xff]  ;;  %v221_v35 = vld [vmem:[#allocation5 + $0x38] sm:$0xff]  ;;  %p901_p5 = pnand %p900_p3, %p894_p10 }
  0x49   : > { %417 = vmatpush1.msra.mxu0 %v274_v11  ;;  %479 = vmatprep.subr.mxu1 %v301_v28  ;;  %v294_v34 = vld [vmem:[#allocation5 + $0x280] sm:$0xff]  ;;  %v289_v36 = vld [vmem:[#allocation5 + $0x258] sm:$0xff]  ;;  %v220_v37 = vld [vmem:[#allocation5 + $0x30] sm:$0xff] }
  0x4a   : > { %418 = vmatprep.subr.mxu0 %v269_v12  ;;  %480 = vmatpush1.msra.mxu1 %v300_v30  ;;  %v288_v38 = vld [vmem:[#allocation5 + $0x250] sm:$0xff]  ;;  %v215_v39 = vld [vmem:[#allocation5 + $0x8] sm:$0xff]  ;;  %v214_v41 = vld [vmem:[#allocation5] sm:$0xff] }
  0x4b   : > { %419 = vmatpush1.msra.mxu0 %v268_v13  ;;  %481 = vmatprep.subr.mxu1 %v295_v32  ;;  %v283_v40 = vld [vmem:[#allocation5 + $0x228] sm:$0xff]  ;;  %v282_v42 = vld [vmem:[#allocation5 + $0x220] sm:$0xff]  ;;  %v401_v43 = vld [vmem:[#allocation5 + $0x5d8] sm:$0xff] }
  0x4c   : > { %420 = vmatprep.subr.mxu0 %v263_v14  ;;  %482 = vmatpush1.msra.mxu1 %v294_v34  ;;  %v277_v44 = vld [vmem:[#allocation5 + $0x1f8] sm:$0xff]  ;;  %v400_v45 = vld [vmem:[#allocation5 + $0x5d0] sm:$0xff]  ;;  %v395_v47 = vld [vmem:[#allocation5 + $0x5a8] sm:$0xff] }
  0x4d   : > { %421 = vmatpush1.msra.mxu0 %v262_v15  ;;  %483 = vmatprep.subr.mxu1 %v289_v36  ;;  %v276_v46 = vld [vmem:[#allocation5 + $0x1f0] sm:$0xff]  ;;  %v271_v48 = vld [vmem:[#allocation5 + $0x1c8] sm:$0xff]  ;;  %v394_v49 = vld [vmem:[#allocation5 + $0x5a0] sm:$0xff] }
  0x4e   : > { %422 = vmatprep.subr.mxu0 %v257_v16  ;;  %484 = vmatpush1.msra.mxu1 %v288_v38  ;;  %v270_v50 = vld [vmem:[#allocation5 + $0x1c0] sm:$0xff]  ;;  %v389_v51 = vld [vmem:[#allocation5 + $0x578] sm:$0xff]  ;;  %v388_v53 = vld [vmem:[#allocation5 + $0x570] sm:$0xff] }
  0x4f   : > { %423 = vmatpush1.msra.mxu0 %v256_v17  ;;  %485 = vmatprep.subr.mxu1 %v283_v40  ;;  %v265_v52 = vld [vmem:[#allocation5 + $0x198] sm:$0xff]  ;;  %v264_v54 = vld [vmem:[#allocation5 + $0x190] sm:$0xff]  ;;  %v383_v55 = vld [vmem:[#allocation5 + $0x548] sm:$0xff] }
  0x50   : > { %424 = vmatprep.subr.mxu0 %v251_v18  ;;  %486 = vmatpush1.msra.mxu1 %v282_v42  ;;  %v259_v56 = vld [vmem:[#allocation5 + $0x168] sm:$0xff]  ;;  %v382_v57 = vld [vmem:[#allocation5 + $0x540] sm:$0xff]  ;;  %v377_v59 = vld [vmem:[#allocation5 + $0x518] sm:$0xff] }
  0x51   : > { %425 = vmatpush1.msra.mxu0 %v250_v19  ;;  %487 = vmatprep.subr.mxu1 %v277_v44  ;;  %v258_v58 = vld [vmem:[#allocation5 + $0x160] sm:$0xff]  ;;  %v253_v60 = vld [vmem:[#allocation5 + $0x138] sm:$0xff]  ;;  %v376_v61 = vld [vmem:[#allocation5 + $0x510] sm:$0xff] }
  0x52   : > { %426 = vmatprep.subr.mxu0 %v245_v20  ;;  %488 = vmatpush1.msra.mxu1 %v276_v46  ;;  %v252_v62 = vld [vmem:[#allocation5 + $0x130] sm:$0xff]  ;;  %v371_v63 = vld [vmem:[#allocation5 + $0x4e8] sm:$0xff]  ;;  %v370_v1 = vld [vmem:[#allocation5 + $0x4e0] sm:$0xff] }
  0x53   : > { %427 = vmatpush1.msra.mxu0 %v244_v21  ;;  %489 = vmatprep.subr.mxu1 %v271_v48  ;;  %v247_v0 = vld [vmem:[#allocation5 + $0x108] sm:$0xff]  ;;  %v246_v2 = vld [vmem:[#allocation5 + $0x100] sm:$0xff]  ;;  %v365_v3 = vld [vmem:[#allocation5 + $0x4b8] sm:$0xff] }
  0x54   : > { %428 = vmatprep.subr.mxu0 %v239_v22  ;;  %490 = vmatpush1.msra.mxu1 %v270_v50  ;;  %v241_v4 = vld [vmem:[#allocation5 + $0xd8] sm:$0xff]  ;;  %v364_v5 = vld [vmem:[#allocation5 + $0x4b0] sm:$0xff]  ;;  %v359_v7 = vld [vmem:[#allocation5 + $0x488] sm:$0xff] }
  0x55   : > { %429 = vmatpush1.msra.mxu0 %v238_v23  ;;  %491 = vmatprep.subr.mxu1 %v265_v52  ;;  %v240_v6 = vld [vmem:[#allocation5 + $0xd0] sm:$0xff]  ;;  %v235_v8 = vld [vmem:[#allocation5 + $0xa8] sm:$0xff]  ;;  %v358_v9 = vld [vmem:[#allocation5 + $0x480] sm:$0xff] }
  0x56   : > { %430 = vmatprep.subr.mxu0 %v233_v26  ;;  %492 = vmatpush1.msra.mxu1 %v264_v54  ;;  %v234_v10 = vld [vmem:[#allocation5 + $0xa0] sm:$0xff]  ;;  %v353_v11 = vld [vmem:[#allocation5 + $0x458] sm:$0xff]  ;;  %v352_v13 = vld [vmem:[#allocation5 + $0x450] sm:$0xff] }
  0x57   : > { %431 = vmatpush1.msra.mxu0 %v232_v29  ;;  %493 = vmatprep.subr.mxu1 %v259_v56  ;;  %v229_v12 = vld [vmem:[#allocation5 + $0x78] sm:$0xff]  ;;  %v228_v14 = vld [vmem:[#allocation5 + $0x70] sm:$0xff]  ;;  %v347_v15 = vld [vmem:[#allocation5 + $0x428] sm:$0xff] }
  0x58   : > { %432 = vmatprep.subr.mxu0 %v227_v31  ;;  %494 = vmatpush1.msra.mxu1 %v258_v58  ;;  %v223_v16 = vld [vmem:[#allocation5 + $0x48] sm:$0xff]  ;;  %v346_v17 = vld [vmem:[#allocation5 + $0x420] sm:$0xff]  ;;  %v341_v19 = vld [vmem:[#allocation5 + $0x3f8] sm:$0xff] }
  0x59   : > { %433 = vmatpush1.msra.mxu0 %v226_v33  ;;  %495 = vmatprep.subr.mxu1 %v253_v60  ;;  %v222_v18 = vld [vmem:[#allocation5 + $0x40] sm:$0xff]  ;;  %v217_v20 = vld [vmem:[#allocation5 + $0x18] sm:$0xff]  ;;  %v340_v21 = vld [vmem:[#allocation5 + $0x3f0] sm:$0xff] }
  0x5a   : > { %434 = vmatprep.subr.mxu0 %v221_v35  ;;  %496 = vmatpush1.msra.mxu1 %v252_v62  ;;  %v216_v22 = vld [vmem:[#allocation5 + $0x10] sm:$0xff]  ;;  %v335_v23 = vld [vmem:[#allocation5 + $0x3c8] sm:$0xff]  ;;  %v334_v26 = vld [vmem:[#allocation5 + $0x3c0] sm:$0xff] }
  0x5b   : > { %435 = vmatpush1.msra.mxu0 %v220_v37  ;;  %497 = vmatprep.subr.mxu1 %v247_v0  ;;  %v403_v24 = vld [vmem:[#allocation5 + $0x5e8] sm:$0xff]  ;;  %v402_v27 = vld [vmem:[#allocation5 + $0x5e0] sm:$0xff]  ;;  %v329_v28 = vld [vmem:[#allocation5 + $0x398] sm:$0xff] }
  0x5c   : > { %436 = vmatprep.subr.mxu0 %v215_v39  ;;  %498 = vmatpush1.msra.mxu1 %v246_v2  ;;  %v397_v29 = vld [vmem:[#allocation5 + $0x5b8] sm:$0xff]  ;;  %v328_v30 = vld [vmem:[#allocation5 + $0x390] sm:$0xff]  ;;  %v323_v32 = vld [vmem:[#allocation5 + $0x368] sm:$0xff] }
  0x5d   : > { %437 = vmatpush1.msra.mxu0 %v214_v41  ;;  %499 = vmatprep.subr.mxu1 %v241_v4  ;;  %v396_v31 = vld [vmem:[#allocation5 + $0x5b0] sm:$0xff]  ;;  %v391_v33 = vld [vmem:[#allocation5 + $0x588] sm:$0xff]  ;;  %v322_v34 = vld [vmem:[#allocation5 + $0x360] sm:$0xff] }
  0x5e   : > { %438 = vmatprep.subr.mxu0 %v401_v43  ;;  %500 = vmatpush1.msra.mxu1 %v240_v6  ;;  %v390_v35 = vld [vmem:[#allocation5 + $0x580] sm:$0xff]  ;;  %v317_v36 = vld [vmem:[#allocation5 + $0x338] sm:$0xff]  ;;  %v316_v38 = vld [vmem:[#allocation5 + $0x330] sm:$0xff] }
  0x5f   : > { %439 = vmatpush2.msra.mxu0 %v400_v45  ;;  %501 = vmatprep.subr.mxu1 %v235_v8  ;;  %v385_v37 = vld [vmem:[#allocation5 + $0x558] sm:$0xff]  ;;  %v384_v39 = vld [vmem:[#allocation5 + $0x550] sm:$0xff]  ;;  %v311_v40 = vld [vmem:[#allocation5 + $0x308] sm:$0xff] }
  0x60   : > { %440 = vmatprep.subr.mxu0 %v395_v47  ;;  %502 = vmatpush1.msra.mxu1 %v234_v10  ;;  %v379_v41 = vld [vmem:[#allocation5 + $0x528] sm:$0xff]  ;;  %v310_v42 = vld [vmem:[#allocation5 + $0x300] sm:$0xff]  ;;  %v309_v45 = vld [vmem:[#allocation5 + $0x2f8] sm:$0xff] }
  0x61   : > { %441 = vmatpush2.msra.mxu0 %v394_v49  ;;  %503 = vmatprep.subr.mxu1 %v229_v12  ;;  %v378_v43 = vld [vmem:[#allocation5 + $0x520] sm:$0xff]  ;;  %v308_v46 = vld [vmem:[#allocation5 + $0x2f0] sm:$0xff]  ;;  %v373_v47 = vld [vmem:[#allocation5 + $0x4f8] sm:$0xff] }
  0x62   : > { %442 = vmatprep.subr.mxu0 %v389_v51  ;;  %504 = vmatpush1.msra.mxu1 %v228_v14  ;;  %v1131_v44 = vld [vmem:[%s1116_s16] sm:$0xff]  ;;  %v303_v48 = vld [vmem:[#allocation5 + $0x2c8] sm:$0xff]  ;;  %v297_v52 = vld [vmem:[#allocation5 + $0x298] sm:$0xff] }
  0x63   : > { %443 = vmatpush2.msra.mxu0 %v388_v53  ;;  %505 = vmatprep.subr.mxu1 %v223_v16  ;;  %v372_v49 = vld [vmem:[#allocation5 + $0x4f0] sm:$0xff]  ;;  %v302_v50 = vld [vmem:[#allocation5 + $0x2c0] sm:$0xff]  ;;  %v367_v51 = vld [vmem:[#allocation5 + $0x4c8] sm:$0xff] }
  0x64   : > { %444 = vmatprep.subr.mxu0 %v383_v55  ;;  %506 = vmatpush1.msra.mxu1 %v222_v18  ;;  %v366_v53 = vld [vmem:[#allocation5 + $0x4c0] sm:$0xff]  ;;  %v296_v54 = vld [vmem:[#allocation5 + $0x290] sm:$0xff]  ;;  %v361_v55 = vld [vmem:[#allocation5 + $0x498] sm:$0xff] }
  0x65   : > { %445 = vmatpush2.msra.mxu0 %v382_v57  ;;  %507 = vmatprep.subr.mxu1 %v217_v20  ;;  %v291_v56 = vld [vmem:[#allocation5 + $0x268] sm:$0xff]  ;;  %v360_v57 = vld [vmem:[#allocation5 + $0x490] sm:$0xff]  ;;  %v290_v58 = vld [vmem:[#allocation5 + $0x260] sm:$0xff] }
  0x66   : > { %446 = vmatprep.subr.mxu0 %v377_v59  ;;  %508 = vmatpush1.msra.mxu1 %v216_v22  ;;  %v355_v59 = vld [vmem:[#allocation5 + $0x468] sm:$0xff]  ;;  %v285_v60 = vld [vmem:[#allocation5 + $0x238] sm:$0xff]  ;;  %v284_v62 = vld [vmem:[#allocation5 + $0x230] sm:$0xff] }
  0x67   : > { %447 = vmatpush2.msra.mxu0 %v376_v61  ;;  %509 = vmatprep.subr.mxu1 %v403_v24  ;;  %v354_v61 = vld [vmem:[#allocation5 + $0x460] sm:$0xff]  ;;  %v279_v0 = vld [vmem:[#allocation5 + $0x208] sm:$0xff]  ;;  %v273_v4 = vld [vmem:[#allocation5 + $0x1d8] sm:$0xff] }
  0x68   : > { %448 = vmatprep.subr.mxu0 %v371_v63  ;;  %510 = vmatpush2.msra.mxu1 %v402_v27  ;;  %v349_v63 = vld [vmem:[#allocation5 + $0x438] sm:$0xff]  ;;  %v278_v2 = vld [vmem:[#allocation5 + $0x200] sm:$0xff]  ;;  %v272_v6 = vld [vmem:[#allocation5 + $0x1d0] sm:$0xff] }
  0x69   : > { %449 = vmatpush2.msra.mxu0 %v370_v1  ;;  %511 = vmatprep.subr.mxu1 %v397_v29  ;;  %v348_v1 = vld [vmem:[#allocation5 + $0x430] sm:$0xff]  ;;  %v267_v8 = vld [vmem:[#allocation5 + $0x1a8] sm:$0xff]  ;;  %v266_v10 = vld [vmem:[#allocation5 + $0x1a0] sm:$0xff] }
  0x6a   : > { %450 = vmatprep.subr.mxu0 %v365_v3  ;;  %512 = vmatpush2.msra.mxu1 %v396_v31  ;;  %v343_v3 = vld [vmem:[#allocation5 + $0x408] sm:$0xff]  ;;  %v261_v12 = vld [vmem:[#allocation5 + $0x178] sm:$0xff]  ;;  %v260_v14 = vld [vmem:[#allocation5 + $0x170] sm:$0xff] }
  0x6b   : > { %451 = vmatpush2.msra.mxu0 %v364_v5  ;;  %513 = vmatprep.subr.mxu1 %v391_v33  ;;  %v342_v5 = vld [vmem:[#allocation5 + $0x400] sm:$0xff]  ;;  %v255_v16 = vld [vmem:[#allocation5 + $0x148] sm:$0xff]  ;;  %v249_v20 = vld [vmem:[#allocation5 + $0x118] sm:$0xff] }
  0x6c   : > { %452 = vmatprep.subr.mxu0 %v359_v7  ;;  %514 = vmatpush2.msra.mxu1 %v390_v35  ;;  %v337_v7 = vld [vmem:[#allocation5 + $0x3d8] sm:$0xff]  ;;  %v254_v18 = vld [vmem:[#allocation5 + $0x140] sm:$0xff]  ;;  %v248_v22 = vld [vmem:[#allocation5 + $0x110] sm:$0xff] }
  0x6d   : > { %453 = vmatpush2.msra.mxu0 %v358_v9  ;;  %515 = vmatprep.subr.mxu1 %v385_v37  ;;  %v336_v9 = vld [vmem:[#allocation5 + $0x3d0] sm:$0xff]  ;;  %v243_v24 = vld [vmem:[#allocation5 + $0xe8] sm:$0xff]  ;;  %v242_v27 = vld [vmem:[#allocation5 + $0xe0] sm:$0xff] }
  0x6e   : > { %454 = vmatprep.subr.mxu0 %v353_v11  ;;  %516 = vmatpush2.msra.mxu1 %v384_v39  ;;  %v331_v11 = vld [vmem:[#allocation5 + $0x3a8] sm:$0xff]  ;;  %v236_v29 = vld [vmem:[#allocation5 + $0xb0] sm:$0xff]  ;;  %v230_v31 = vld [vmem:[#allocation5 + $0x80] sm:$0xff] }
  0x6f   : > { %455 = vmatpush2.msra.mxu0 %v352_v13  ;;  %517 = vmatprep.subr.mxu1 %v379_v41  ;;  %v330_v13 = vld [vmem:[#allocation5 + $0x3a0] sm:$0xff]  ;;  %v224_v33 = vld [vmem:[#allocation5 + $0x50] sm:$0xff] }
  0x70   : > { %456 = vmatprep.subr.mxu0 %v347_v15  ;;  %518 = vmatpush2.msra.mxu1 %v378_v43  ;;  %v325_v15 = vld [vmem:[#allocation5 + $0x378] sm:$0xff]  ;;  %v218_v35 = vld [vmem:[#allocation5 + $0x20] sm:$0xff]  ;;  %v404_v37 = vld [vmem:[#allocation5 + $0x5f0] sm:$0xff] }
  0x71   : > { %457 = vmatpush2.msra.mxu0 %v346_v17  ;;  %519 = vmatprep.subr.mxu1 %v373_v47  ;;  %v324_v17 = vld [vmem:[#allocation5 + $0x370] sm:$0xff]  ;;  %v398_v39 = vld [vmem:[#allocation5 + $0x5c0] sm:$0xff]  ;;  %v381_v43 = vld [vmem:[#allocation5 + $0x538] sm:$0xff] }
  0x72   : > { %458 = vmatprep.subr.mxu0 %v341_v19  ;;  %520 = vmatpush2.msra.mxu1 %v372_v49  ;;  %v319_v19 = vld [vmem:[#allocation5 + $0x348] sm:$0xff]  ;;  %v392_v41 = vld [vmem:[#allocation5 + $0x590] sm:$0xff]  ;;  %v374_v47 = vld [vmem:[#allocation5 + $0x500] sm:$0xff] }
  0x73   : > { %459 = vmatpush2.msra.mxu0 %v340_v21  ;;  %521 = vmatprep.subr.mxu1 %v367_v51  ;;  %v318_v21 = vld [vmem:[#allocation5 + $0x340] sm:$0xff]  ;;  %v368_v49 = vld [vmem:[#allocation5 + $0x4d0] sm:$0xff] }
  0x74   : > { %460 = vmatprep.subr.mxu0 %v335_v23  ;;  %522 = vmatpush2.msra.mxu1 %v366_v53  ;;  %v313_v23 = vld [vmem:[#allocation5 + $0x318] sm:$0xff]  ;;  %v362_v51 = vld [vmem:[#allocation5 + $0x4a0] sm:$0xff]  ;;  %v356_v53 = vld [vmem:[#allocation5 + $0x470] sm:$0xff] }
  0x75   : > { %461 = vmatpush2.msra.mxu0 %v334_v26  ;;  %523 = vmatprep.subr.mxu1 %v361_v55  ;;  %v312_v26 = vld [vmem:[#allocation5 + $0x310] sm:$0xff]  ;;  %v350_v55 = vld [vmem:[#allocation5 + $0x440] sm:$0xff] }
  0x76   : > { %462 = vmatprep.subr.mxu0 %v329_v28  ;;  %524 = vmatpush2.msra.mxu1 %v360_v57  ;;  %v237_v28 = vld [vmem:[#allocation5 + $0xb8] sm:$0xff]  ;;  %v344_v57 = vld [vmem:[#allocation5 + $0x410] sm:$0xff] }
  0x77   : > { %463 = vmatpush2.msra.mxu0 %v328_v30  ;;  %525 = vmatprep.subr.mxu1 %v355_v59  ;;  %v231_v30 = vld [vmem:[#allocation5 + $0x88] sm:$0xff]  ;;  %v338_v59 = vld [vmem:[#allocation5 + $0x3e0] sm:$0xff] }
  0x78   : > { %464 = vmatprep.subr.mxu0 %v323_v32  ;;  %526 = vmatpush2.msra.mxu1 %v354_v61  ;;  %v225_v32 = vld [vmem:[#allocation5 + $0x58] sm:$0xff]  ;;  %v332_v61 = vld [vmem:[#allocation5 + $0x3b0] sm:$0xff] }
  0x79   : > { %465 = vmatpush2.msra.mxu0 %v322_v34  ;;  %527 = vmatprep.subr.mxu1 %v349_v63  ;;  %v219_v34 = vld [vmem:[#allocation5 + $0x28] sm:$0xff]  ;;  %v326_v63 = vld [vmem:[#allocation5 + $0x380] sm:$0xff] }
  0x7a   : > { %466 = vmatprep.subr.mxu0 %v317_v36  ;;  %528 = vmatpush2.msra.mxu1 %v348_v1  ;;  %v405_v36 = vld [vmem:[#allocation5 + $0x5f8] sm:$0xff]  ;;  %v320_v1 = vld [vmem:[#allocation5 + $0x350] sm:$0xff] }
  0x7b   : > { %467 = vmatpush2.msra.mxu0 %v316_v38  ;;  %529 = vmatprep.subr.mxu1 %v343_v3  ;;  %v399_v38 = vld [vmem:[#allocation5 + $0x5c8] sm:$0xff]  ;;  %v314_v3 = vld [vmem:[#allocation5 + $0x320] sm:$0xff] }
  0x7c   : > { %468 = vmatprep.subr.mxu0 %v311_v40  ;;  %530 = vmatpush2.msra.mxu1 %v342_v5  ;;  %v393_v40 = vld [vmem:[#allocation5 + $0x598] sm:$0xff] }
  0x7d   : > { %469 = vmatpush2.msra.mxu0 %v310_v42  ;;  %531 = vmatprep.subr.mxu1 %v337_v7  ;;  %v386_v42 = vld [vmem:[#allocation5 + $0x560] sm:$0xff] }
  0x7e   : > { %471 = vmatmul.mubr.f32.vlgmr.msra.gmra.mxu0 %v1131_v44  ;;  %548 = vmatprep.subr.mxu0 %v309_v45  ;;  %v380_v45 = vld [vmem:[#allocation5 + $0x530] sm:$0xff] }
  0x7f   : > { %549 = vmatpush1.msra.mxu0 %v308_v46  ;;  %532 = vmatpush2.msra.mxu1 %v336_v9  ;;  %v375_v46 = vld [vmem:[#allocation5 + $0x508] sm:$0xff] }
  0x80   : > { %550 = vmatprep.subr.mxu0 %v303_v48  ;;  %533 = vmatprep.subr.mxu1 %v331_v11  ;;  %v369_v48 = vld [vmem:[#allocation5 + $0x4d8] sm:$0xff] }
  0x81   : > { %551 = vmatpush1.msra.mxu0 %v302_v50  ;;  %534 = vmatpush2.msra.mxu1 %v330_v13  ;;  %v363_v50 = vld [vmem:[#allocation5 + $0x4a8] sm:$0xff] }
  0x82   : > { %552 = vmatprep.subr.mxu0 %v297_v52  ;;  %535 = vmatprep.subr.mxu1 %v325_v15  ;;  %v357_v52 = vld [vmem:[#allocation5 + $0x478] sm:$0xff] }
  0x83   : > { %553 = vmatpush1.msra.mxu0 %v296_v54  ;;  %536 = vmatpush2.msra.mxu1 %v324_v17  ;;  %v351_v54 = vld [vmem:[#allocation5 + $0x448] sm:$0xff] }
  0x84   : > { %554 = vmatprep.subr.mxu0 %v291_v56  ;;  %537 = vmatprep.subr.mxu1 %v319_v19  ;;  %v345_v56 = vld [vmem:[#allocation5 + $0x418] sm:$0xff] }
  0x85   : > { %555 = vmatpush1.msra.mxu0 %v290_v58  ;;  %538 = vmatpush2.msra.mxu1 %v318_v21  ;;  %v339_v58 = vld [vmem:[#allocation5 + $0x3e8] sm:$0xff] }
  0x86   : > { %556 = vmatprep.subr.mxu0 %v285_v60  ;;  %539 = vmatprep.subr.mxu1 %v313_v23  ;;  %v333_v60 = vld [vmem:[#allocation5 + $0x3b8] sm:$0xff] }
  0x87   : > { %557 = vmatpush1.msra.mxu0 %v284_v62  ;;  %540 = vmatpush2.msra.mxu1 %v312_v26  ;;  %v327_v62 = vld [vmem:[#allocation5 + $0x388] sm:$0xff] }
  0x88   : > { %558 = vmatprep.subr.mxu0 %v279_v0  ;;  %541 = vmatprep.mubr.f32.mxu1 %v1127_v25  ;;  %v321_v0 = vld [vmem:[#allocation5 + $0x358] sm:$0xff] }
  0x89   : > { %559 = vmatpush1.msra.mxu0 %v278_v2  ;;  %542 = vmatmul.mubr.f32.vlgmr.msra.gmra.mxu1 %v1131_v44  ;;  %v315_v2 = vld [vmem:[#allocation5 + $0x328] sm:$0xff] }
  0x8a   : > { %560 = vmatprep.subr.mxu0 %v273_v4  ;;  %612 = vmatprep.mubr.f32.mxu0 %v1127_v25  ;;  %v387_v25 = vld [vmem:[#allocation5 + $0x568] sm:$0xff] }
  0x8b   : > { %561 = vmatpush1.msra.mxu0 %v272_v6 }
  0x8c   : > { %562 = vmatprep.subr.mxu0 %v267_v8 }
  0x8d   : > { %563 = vmatpush1.msra.mxu0 %v266_v10 }
  0x8e   : > { %564 = vmatprep.subr.mxu0 %v261_v12 }
  0x8f   : > { %565 = vmatpush1.msra.mxu0 %v260_v14 }
  0x90   : > { %566 = vmatprep.subr.mxu0 %v255_v16 }
  0x91   : > { %567 = vmatpush1.msra.mxu0 %v254_v18 }
  0x92   : > { %568 = vmatprep.subr.mxu0 %v249_v20 }
  0x93   : > { %569 = vmatpush1.msra.mxu0 %v248_v22 }
  0x94   : > { %570 = vmatprep.subr.mxu0 %v243_v24 }
  0x95   : > { %571 = vmatpush1.msra.mxu0 %v242_v27 }
  0x96   : > { %572 = vmatprep.subr.mxu0 %v237_v28 }
  0x97   : > { %573 = vmatpush1.msra.mxu0 %v236_v29 }
  0x98   : > { %574 = vmatprep.subr.mxu0 %v231_v30 }
  0x99   : > { %575 = vmatpush1.msra.mxu0 %v230_v31 }
  0x9a   : > { %576 = vmatprep.subr.mxu0 %v225_v32 }
  0x9b   : > { %577 = vmatpush1.msra.mxu0 %v224_v33 }
  0x9c   : > { %578 = vmatprep.subr.mxu0 %v219_v34 }
  0x9d   : > { %579 = vmatpush1.msra.mxu0 %v218_v35 }
  0x9e   : > { %580 = vmatprep.subr.mxu0 %v405_v36 }
  0x9f   : > { %581 = vmatpush2.msra.mxu0 %v404_v37 }
  0xa0   : > { %582 = vmatprep.subr.mxu0 %v399_v38 }
  0xa1   : > { %583 = vmatpush2.msra.mxu0 %v398_v39 }
  0xa2   : > { %584 = vmatprep.subr.mxu0 %v393_v40 }
  0xa3   : > { %585 = vmatpush2.msra.mxu0 %v392_v41 }
  0xa4   : > { %586 = vmatprep.subr.mxu0 %v387_v25 }
  0xa5   : > { %587 = vmatpush2.msra.mxu0 %v386_v42 }
  0xa6   : > { %588 = vmatprep.subr.mxu0 %v381_v43 }
  0xa7   : > { %589 = vmatpush2.msra.mxu0 %v380_v45 }
  0xa8   : > { %590 = vmatprep.subr.mxu0 %v375_v46 }
  0xa9   : > { %591 = vmatpush2.msra.mxu0 %v374_v47 }
  0xaa   : > { %592 = vmatprep.subr.mxu0 %v369_v48 }
  0xab   : > { %593 = vmatpush2.msra.mxu0 %v368_v49 }
  0xac   : > { %594 = vmatprep.subr.mxu0 %v363_v50 }
  0xad   : > { %595 = vmatpush2.msra.mxu0 %v362_v51 }
  0xae   : > { %596 = vmatprep.subr.mxu0 %v357_v52 }
  0xaf   : > { %597 = vmatpush2.msra.mxu0 %v356_v53 }
  0xb0   : > { %598 = vmatprep.subr.mxu0 %v351_v54 }
  0xb1   : > { %599 = vmatpush2.msra.mxu0 %v350_v55 }
  0xb2   : > { %600 = vmatprep.subr.mxu0 %v345_v56 }
  0xb3   : > { %601 = vmatpush2.msra.mxu0 %v344_v57 }
  0xb4   : > { %602 = vmatprep.subr.mxu0 %v339_v58 }
  0xb5   : > { %603 = vmatpush2.msra.mxu0 %v338_v59 }
  0xb6   : > { %604 = vmatprep.subr.mxu0 %v333_v60 }
  0xb7   : > { %605 = vmatpush2.msra.mxu0 %v332_v61 }
  0xb8   : > { %606 = vmatprep.subr.mxu0 %v327_v62 }
  0xb9   : > { %607 = vmatpush2.msra.mxu0 %v326_v63 }
  0xba   : > { %608 = vmatprep.subr.mxu0 %v321_v0 }
  0xbb   : > { %609 = vmatpush2.msra.mxu0 %v320_v1 }
  0xbc   : > { %610 = vmatprep.subr.mxu0 %v315_v2 }
  0xbd   : > { %611 = vmatpush2.msra.mxu0 %v314_v3 }
  0xbe   : > { %613 = vmatmul.mubr.f32.vlgmr.msra.gmra.mxu0 %v1131_v44 }
 0x13e   : > { %v472_v4 = vpop.f32.mrf.mxu0 }
 0x13f   : > { %619 = vst [vmem:[%s209_s19] sm:$0xff] %v472_v4 }
 0x140   : > { %v474_v5 = vpop.f32.mrf.mxu0 }
 0x141   : > { %620 = vst [vmem:[%s209_s19 + $0x8] sm:$0xff] %v474_v5 }
 0x149   : > { %v543_v6 = vpop.f32.mrf.mxu1 }
 0x14a   : > { %621 = vst [vmem:[%s209_s19 + $0x10] sm:$0xff] %v543_v6 }
 0x14b   : > { %v545_v7 = vpop.f32.mrf.mxu1 }
 0x14c   : > { %622 = vst [vmem:[%s209_s19 + $0x18] sm:$0xff] %v545_v7 }
 0x17e   : > { %v614_v8 = vpop.f32.mrf.mxu0 }
 0x17f   : > { %623 = vst [vmem:[%s209_s19 + $0x20] sm:$0xff] %v614_v8 }
 0x180   : > { %v616_v44 = vpop.f32.mrf.mxu0 }
 0x181   : > { %624 = vst [vmem:[%s209_s19 + $0x28] sm:$0xff] %v616_v44 }
 0x182   : > { %904 = shalt.err (!%p901_p5)
}
 0x183   : > { %s905_s30 = scalar_lea.hbm %s1143_s26, 768  ;;  %s909_s4 = scalar_lea.hbm %s1187_s2, 1536 }
 0x184   : > { %p906_p7 = scmp.ne.s32.totalorder %s1143_s26, %s905_s30  ;;  %p910_p9 = scmp.lt.s32.totalorder %s1143_s26, %s1187_s2 }
 0x185   : > { %p911_p11 = scmp.lt.s32.totalorder %s909_s4, %s905_s30 }
 0x186   : > { %p907_p6 = pnand %p906_p7, %p1084_p13 }
 0x187   : > { %p912_p12 = por %p911_p11, %p910_p9 }
 0x188   : > { %p908_p4 = pneg %p907_p6 }
 0x18a   : > { %p913_p1 = pnand %p912_p12, %p908_p4 }
 0x18c   : > { %916 = shalt.err (!%p913_p1)
}
 0x18d   : > { %768 = dma.vmem_to_hbm [thread:$0]  (%p1084_p13), %s645_s22, 768, %s1143_s26, %s626_s27  }
 0x18e PF: > { %s656_s16 = sand.u32 1, %s955_s9   ;;  %p1199_p8 = scmp.ne.s32.totalorder %s1192_s20, 0 }
 0x18f   : > { %p1200_p10 = scmp.ge.s32.totalorder %s975_s14, 2  ;;  %s657_s17 = scalar_lea.sflag [#allocation4], %s656_s16 }
 0x191   : > { %p779_p0 = pnand %p1200_p10, %p1199_p8 }
 0x193   : > { %p780_p2 = pneg %p779_p0 }
 0x195   : > { %950 = dma.done.wait (%p780_p2), %s657_s17, 768  }
 0x196   : > { %952 = vsyncadd (%p780_p2), %s657_s17, 4294966528  ;;  %s19_s14 = sadd.s32 1, %s975_s14   ;;  %s1201_s9 = smov %s959_s10 }
 0x197   : > { %p16_p3 = scmp.ge.s32.totalorder %s19_s14, 4   ;;  %s1202_s10 = smov %s963_s11 }
 0x198   : > { %s1203_s11 = smov %s1093_s15  ;;  %s1204_s12 = smov %s971_s13 }
 0x199   : > { %s1205_s13 = smov %s1207_s25  ;;  %18 = sbr.rel (!%p16_p3) target bundleno = 7 (0x7), region = 78 }
 0x19e   :  { %662 = vsyncpa [#allocation3], 1 }
 0x19f   :  { %664 = vsyncpa [#allocation3 + $0x1], 1 }
 0x1a0   :  { %665 = vsyncpa [#allocation6], 1 }
 0x1a1   :  { %666 = vsyncpa [#allocation4], 1 }
 0x1a2   :  { %668 = vsyncpa [#allocation4 + $0x1], 1 }

</bundles_post_ra>
